<compile_context>
chip_gen: v7x
topology: tpu7x:2x2x1
jax: 0.10.0
libtpu: 0.0.40
codegen_flags: <defaults>
</compile_context>

<pallas_src>
import math

import jax
import jax.numpy as jnp
from jax.experimental import pallas as pl
from jax.experimental.pallas import tpu as pltpu

_LANE = 128
_VMEM_LIMIT_BYTES = 32 * 1024 * 1024  # safe on v5e/v6e (128 MiB) and v7x (64 MiB)


def _round_up(n, m):
    return ((n + m - 1) // m) * m


def _pad_axis(a, axis, target):
    pad = target - a.shape[axis]
    if pad == 0:
        return a
    widths = [(0, 0)] * a.ndim
    widths[axis] = (0, pad)
    return jnp.pad(a, widths)


def attention_head_kernel(x_ref, wq_ref, wk_ref, wv_ref,
                          bq_ref, bk_ref, bv_ref, wout_ref, bout_ref, o_ref):
    bblk, T, Ep = x_ref.shape
    Hp = wq_ref.shape[1]
    rows = bblk * T

    # Collapse (block_b, T) into one row dim so each projection is a single
    # large MXU matmul; the wrapper guarantees T is a sublane-pack multiple,
    # so this reshape is a free relayout.  Operands stay in the input dtype,
    # accumulation is fp32.  The 1/sqrt(H) scale is already folded into wq/bq.
    x2 = x_ref[...].reshape(rows, Ep)

    q = jnp.dot(x2, wq_ref[...], preferred_element_type=jnp.float32) + bq_ref[...]
    k = jnp.dot(x2, wk_ref[...], preferred_element_type=jnp.float32) + bk_ref[...]
    v = jnp.dot(x2, wv_ref[...], preferred_element_type=jnp.float32) + bv_ref[...]

    # Back to per-batch-element layout; cast MXU operands back to the input
    # dtype so bf16 inputs stay on the bf16 MXU path.
    q3 = q.reshape(bblk, T, Hp).astype(x_ref.dtype)
    k3 = k.reshape(bblk, T, Hp).astype(x_ref.dtype)
    v3 = v.reshape(bblk, T, Hp).astype(x_ref.dtype)

    # Scores: contract the last dims directly (no explicit k transpose).
    scores = jnp.einsum("bqh,bkh->bqk", q3, k3,
                        preferred_element_type=jnp.float32)

    # Numerically stable softmax in fp32.  Exact reciprocal: the approximate
    # EUP reciprocal is too coarse for the reference tolerance.
    scores = scores - jnp.max(scores, axis=-1, keepdims=True)
    probs = jnp.exp(scores)
    denom = jnp.sum(probs, axis=-1, keepdims=True)
    probs = probs * pl.reciprocal(denom, approx=False)

    attn = jnp.einsum("bqk,bkh->bqh", probs.astype(v3.dtype), v3,
                      preferred_element_type=jnp.float32)

    # Output projection over the collapsed row slab, then a lane-dense store.
    out = jnp.dot(attn.reshape(rows, Hp).astype(x_ref.dtype), wout_ref[...],
                  preferred_element_type=jnp.float32) + bout_ref[...]
    o_ref[...] = out.reshape(bblk, T, Ep).astype(o_ref.dtype)


def _vmem_bytes(block_b, T, Ep, Hp, x_bytes, o_bytes, w_bytes):
    """Per-grid-step VMEM footprint: double-buffered tiles + double-buffered
    weights + the fp32 intermediates the compiler has to hold."""
    rows = block_b * T
    tiles = 2 * rows * Ep * (x_bytes + o_bytes)            # in + out tiles, 2 buffers each
    weights = 2 * w_bytes * (4 * Ep * Hp + 3 * Hp + Ep)    # wq/wk/wv/wout + biases, 2 buffers
    interm = 4 * (3 * rows * Hp            # q, k, v (fp32)
                  + 2 * block_b * T * T    # scores + probs (fp32)
                  + rows * Hp              # attn (fp32)
                  + rows * Ep)             # projected output slab (fp32)
    return tiles + weights + interm


def _choose_block_b(B, T, Ep, Hp, x_bytes, o_bytes, w_bytes, budget):
    best = 1
    for d in range(1, B + 1):
        if B % d:
            continue
        if B >= 2 and B // d < 2:
            # Keep >= 2 grid steps so the "parallel" axis can shard across
            # v7x's two TensorCores and the pipeline has work to overlap.
            continue
        if d * T > 1024:
            # Beyond ~1k rows the MXU is saturated; extra rows only cost VMEM.
            continue
        if _vmem_bytes(d, T, Ep, Hp, x_bytes, o_bytes, w_bytes) > budget:
            continue
        best = d
    return best


def attention_head(x, wqkv, bqkv, wout, bout, *, block_b=None):
    """x: (B, T, E). wqkv: (E, 3H). bqkv: (3H,). wout: (H, E). bout: (E,)."""
    B, T, E = x.shape
    H = wout.shape[0]
    assert wqkv.shape == (E, 3 * H)

    # The in-kernel row collapse is only a free relayout when T is a multiple
    # of the sublane pack for the dtype.
    sublane_pack = 16 if x.dtype == jnp.bfloat16 else 8
    assert T % sublane_pack == 0, (
        "TODO(synk): add a non-collapsed per-batch matmul path for T not a "
        "multiple of the sublane pack")

    # Split the fused QKV weight, fold the score scale into wq/bq, and pad
    # head/emb dims up to 128 lanes (exact, see header comment).
    scale = 1.0 / math.sqrt(H)
    Ep = _round_up(E, _LANE)
    Hp = _round_up(H, _LANE)

    wq = _pad_axis(_pad_axis(wqkv[:, :H] * scale, 1, Hp), 0, Ep)
    wk = _pad_axis(_pad_axis(wqkv[:, H:2 * H], 1, Hp), 0, Ep)
    wv = _pad_axis(_pad_axis(wqkv[:, 2 * H:], 1, Hp), 0, Ep)
    bq = _pad_axis((bqkv[:H] * scale).reshape(1, H), 1, Hp)
    bk = _pad_axis(bqkv[H:2 * H].reshape(1, H), 1, Hp)
    bv = _pad_axis(bqkv[2 * H:].reshape(1, H), 1, Hp)
    wo = _pad_axis(_pad_axis(wout, 1, Ep), 0, Hp)
    bo = _pad_axis(bout.reshape(1, E), 1, Ep)
    xp = _pad_axis(x, 2, Ep)

    x_bytes = xp.dtype.itemsize
    w_bytes = wq.dtype.itemsize
    if block_b is None:
        block_b = _choose_block_b(B, T, Ep, Hp, x_bytes, x_bytes, w_bytes,
                                  budget=int(0.8 * _VMEM_LIMIT_BYTES))
    assert B % block_b == 0
    grid_b = B // block_b

    flops = 2 * B * T * (3 * Ep * Hp + 2 * T * Hp + Hp * Ep)
    bytes_accessed = (xp.size * x_bytes + B * T * Ep * x_bytes
                      + (wq.size + wk.size + wv.size + wo.size
                         + bq.size + bk.size + bv.size + bo.size) * w_bytes)

    const2d = lambda b: (0, 0)
    out_padded = pl.pallas_call(
        attention_head_kernel,
        out_shape=jax.ShapeDtypeStruct((B, T, Ep), x.dtype),
        grid_spec=pltpu.PrefetchScalarGridSpec(
            num_scalar_prefetch=0,
            grid=(grid_b,),
            in_specs=[
                pl.BlockSpec((block_b, T, Ep), lambda b: (b, 0, 0)),
                pl.BlockSpec((Ep, Hp), const2d),
                pl.BlockSpec((Ep, Hp), const2d),
                pl.BlockSpec((Ep, Hp), const2d),
                pl.BlockSpec((1, Hp), const2d),
                pl.BlockSpec((1, Hp), const2d),
                pl.BlockSpec((1, Hp), const2d),
                pl.BlockSpec((Hp, Ep), const2d),
                pl.BlockSpec((1, Ep), const2d),
            ],
            out_specs=pl.BlockSpec((block_b, T, Ep), lambda b: (b, 0, 0)),
        ),
        compiler_params=pltpu.CompilerParams(
            dimension_semantics=("parallel",),
            vmem_limit_bytes=_VMEM_LIMIT_BYTES),
        cost_estimate=pl.CostEstimate(
            flops=flops,
            transcendentals=B * T * T,
            bytes_accessed=bytes_accessed),
    )(xp, wq, wk, wv, bq, bk, bv, wo, bo)

    # Drop the lane padding on the embedding dim (no-op when E % 128 == 0).
    return out_padded[..., :E]


def attention_head_ref(x, wqkv, bqkv, wout, bout):
    """Plain-JAX reference matching the PyTorch forward (full precision)."""
    hi = jax.lax.Precision.HIGHEST
    qkv = jnp.einsum("bte,ef->btf", x, wqkv, precision=hi) + bqkv
    H = wout.shape[0]
    q, k, v = qkv[..., :H], qkv[..., H:2 * H], qkv[..., 2 * H:]
    scores = jnp.einsum("bqh,bkh->bqk", q, k, precision=hi) / math.sqrt(H)
    probs = jax.nn.softmax(scores, axis=-1)
    attn = jnp.einsum("bqk,bkh->bqh", probs, v, precision=hi)
    return jnp.einsum("bth,he->bte", attn, wout, precision=hi) + bout


if __name__ == "__main__":
    # Small shapes consistent with the module: batch=2, seq=8, emb=32, head=16
    B, T, E, H = 2, 8, 32, 16

    key = jax.random.PRNGKey(0)
    kx, k1, k2, k3, k4 = jax.random.split(key, 5)

    x = jax.random.normal(kx, (B, T, E), dtype=jnp.float32)

    # Deterministic parameter init (PyTorch Linear stores W as (out, in);
    # we store the already-transposed (in, out) form for x @ W).
    bound_qkv = 1.0 / math.sqrt(E)
    wqkv = jax.random.uniform(k1, (E, 3 * H), minval=-bound_qkv,
                              maxval=bound_qkv, dtype=jnp.float32)
    bqkv = jax.random.uniform(k2, (3 * H,), minval=-bound_qkv,
                              maxval=bound_qkv, dtype=jnp.float32)
    bound_out = 1.0 / math.sqrt(H)
    wout = jax.random.uniform(k3, (H, E), minval=-bound_out,
                              maxval=bound_out, dtype=jnp.float32)
    bout = jax.random.uniform(k4, (E,), minval=-bound_out,
                              maxval=bound_out, dtype=jnp.float32)

    out = attention_head(x, wqkv, bqkv, wout, bout)
    out = jax.block_until_ready(out)

    ref = attention_head_ref(x, wqkv, bqkv, wout, bout)
    assert out.shape == (B, T, E)
    assert jnp.allclose(out, ref, atol=2e-4, rtol=2e-4), "mismatch vs reference"

    print("KERNEL_OK")
</pallas_src>

<mosaic_0001>
module attributes {stable_mosaic.version = 11 : i64} {
  func.func @attention_head_kernel(%arg0: i32, %arg1: memref<1x8x128xf32, #tpu.memory_space<vmem>>, %arg2: memref<128x128xf32, #tpu.memory_space<vmem>>, %arg3: memref<128x128xf32, #tpu.memory_space<vmem>>, %arg4: memref<128x128xf32, #tpu.memory_space<vmem>>, %arg5: memref<1x128xf32, #tpu.memory_space<vmem>>, %arg6: memref<1x128xf32, #tpu.memory_space<vmem>>, %arg7: memref<1x128xf32, #tpu.memory_space<vmem>>, %arg8: memref<128x128xf32, #tpu.memory_space<vmem>>, %arg9: memref<1x128xf32, #tpu.memory_space<vmem>>, %arg10: memref<1x8x128xf32, #tpu.memory_space<vmem>>) attributes {dimension_semantics = [#tpu.dimension_semantics<parallel>], iteration_bounds = array<i64: 2>, scalar_prefetch = 0 : i64, scratch_operands = 0 : i64, tpu.core_type = #tpu.core_type<tc>, window_params = [{transform_indices = @transform_0, window_bounds = array<i64: 1, 8, 128>}, {pipeline_mode = #tpu.pipeline_mode<synchronous>, transform_indices = @transform_1, window_bounds = array<i64: 128, 128>}, {pipeline_mode = #tpu.pipeline_mode<synchronous>, transform_indices = @transform_2, window_bounds = array<i64: 128, 128>}, {pipeline_mode = #tpu.pipeline_mode<synchronous>, transform_indices = @transform_3, window_bounds = array<i64: 128, 128>}, {pipeline_mode = #tpu.pipeline_mode<synchronous>, transform_indices = @transform_4, window_bounds = array<i64: 1, 128>}, {pipeline_mode = #tpu.pipeline_mode<synchronous>, transform_indices = @transform_5, window_bounds = array<i64: 1, 128>}, {pipeline_mode = #tpu.pipeline_mode<synchronous>, transform_indices = @transform_6, window_bounds = array<i64: 1, 128>}, {pipeline_mode = #tpu.pipeline_mode<synchronous>, transform_indices = @transform_7, window_bounds = array<i64: 128, 128>}, {pipeline_mode = #tpu.pipeline_mode<synchronous>, transform_indices = @transform_8, window_bounds = array<i64: 1, 128>}, {transform_indices = @transform_9, window_bounds = array<i64: 1, 8, 128>}]} {
    %c0 = arith.constant 0 : index
    %c0_0 = arith.constant 0 : index
    %c0_1 = arith.constant 0 : index
    %0 = vector.load %arg1[%c0, %c0_0, %c0_1] : memref<1x8x128xf32, #tpu.memory_space<vmem>>, vector<1x8x128xf32>
    %1 = vector.shape_cast %0 : vector<1x8x128xf32> to vector<8x128xf32>
    %c0_2 = arith.constant 0 : index
    %c0_3 = arith.constant 0 : index
    %2 = vector.load %arg2[%c0_2, %c0_3] : memref<128x128xf32, #tpu.memory_space<vmem>>, vector<128x128xf32>
    %cst = arith.constant dense<0.000000e+00> : vector<8x128xf32>
    %3 = tpu.matmul %1, %2, %cst {dimension_numbers = #tpu.dot_dimension_numbers<[1], [0], [0], [1], [0, 0, 1, 1], [], []>} : vector<8x128xf32>, vector<128x128xf32>, vector<8x128xf32> -> vector<8x128xf32>
    %c0_4 = arith.constant 0 : index
    %c0_5 = arith.constant 0 : index
    %4 = vector.load %arg5[%c0_4, %c0_5] : memref<1x128xf32, #tpu.memory_space<vmem>>, vector<1x128xf32>
    %5 = vector.broadcast %4 : vector<1x128xf32> to vector<8x128xf32>
    %6 = arith.addf %3, %5 : vector<8x128xf32>
    %c0_6 = arith.constant 0 : index
    %c0_7 = arith.constant 0 : index
    %7 = vector.load %arg3[%c0_6, %c0_7] : memref<128x128xf32, #tpu.memory_space<vmem>>, vector<128x128xf32>
    %cst_8 = arith.constant dense<0.000000e+00> : vector<8x128xf32>
    %8 = tpu.matmul %1, %7, %cst_8 {dimension_numbers = #tpu.dot_dimension_numbers<[1], [0], [0], [1], [0, 0, 1, 1], [], []>} : vector<8x128xf32>, vector<128x128xf32>, vector<8x128xf32> -> vector<8x128xf32>
    %c0_9 = arith.constant 0 : index
    %c0_10 = arith.constant 0 : index
    %9 = vector.load %arg6[%c0_9, %c0_10] : memref<1x128xf32, #tpu.memory_space<vmem>>, vector<1x128xf32>
    %10 = vector.broadcast %9 : vector<1x128xf32> to vector<8x128xf32>
    %11 = arith.addf %8, %10 : vector<8x128xf32>
    %c0_11 = arith.constant 0 : index
    %c0_12 = arith.constant 0 : index
    %12 = vector.load %arg4[%c0_11, %c0_12] : memref<128x128xf32, #tpu.memory_space<vmem>>, vector<128x128xf32>
    %cst_13 = arith.constant dense<0.000000e+00> : vector<8x128xf32>
    %13 = tpu.matmul %1, %12, %cst_13 {dimension_numbers = #tpu.dot_dimension_numbers<[1], [0], [0], [1], [0, 0, 1, 1], [], []>} : vector<8x128xf32>, vector<128x128xf32>, vector<8x128xf32> -> vector<8x128xf32>
    %c0_14 = arith.constant 0 : index
    %c0_15 = arith.constant 0 : index
    %14 = vector.load %arg7[%c0_14, %c0_15] : memref<1x128xf32, #tpu.memory_space<vmem>>, vector<1x128xf32>
    %15 = vector.broadcast %14 : vector<1x128xf32> to vector<8x128xf32>
    %16 = arith.addf %13, %15 : vector<8x128xf32>
    %17 = vector.shape_cast %6 : vector<8x128xf32> to vector<1x8x128xf32>
    %18 = vector.shape_cast %11 : vector<8x128xf32> to vector<1x8x128xf32>
    %19 = vector.shape_cast %16 : vector<8x128xf32> to vector<1x8x128xf32>
    "tpu.trace_start"() <{level = 10 : i32, message = "bqh,bkh->bqk"}> : () -> ()
    %cst_16 = arith.constant dense<0.000000e+00> : vector<1x8x8xf32>
    %20 = tpu.matmul %17, %18, %cst_16 {dimension_numbers = #tpu.dot_dimension_numbers<[2], [2], [1], [1], [0, 0, 0, 1, 1, 1], [0], [0]>} : vector<1x8x128xf32>, vector<1x8x128xf32>, vector<1x8x8xf32> -> vector<1x8x8xf32>
    "tpu.trace_stop"() : () -> ()
    %cst_17 = arith.constant dense<0xFF800000> : vector<1x8xf32>
    %21 = vector.multi_reduction <maximumf>, %20, %cst_17 [2] : vector<1x8x8xf32> to vector<1x8xf32>
    %22 = vector.shape_cast %21 : vector<1x8xf32> to vector<1x8x1xf32>
    %23 = vector.broadcast %22 : vector<1x8x1xf32> to vector<1x8x8xf32>
    %24 = arith.subf %20, %23 : vector<1x8x8xf32>
    %25 = math.exp %24 : vector<1x8x8xf32>
    %cst_18 = arith.constant dense<0.000000e+00> : vector<1x8xf32>
    %26 = vector.multi_reduction <add>, %25, %cst_18 [2] : vector<1x8x8xf32> to vector<1x8xf32>
    %27 = vector.shape_cast %26 : vector<1x8xf32> to vector<1x8x1xf32>
    %28 = tpu.reciprocal %27 : vector<1x8x1xf32> -> vector<1x8x1xf32>
    %29 = vector.broadcast %28 : vector<1x8x1xf32> to vector<1x8x8xf32>
    %30 = arith.mulf %25, %29 : vector<1x8x8xf32>
    "tpu.trace_start"() <{level = 10 : i32, message = "bqk,bkh->bqh"}> : () -> ()
    %cst_19 = arith.constant dense<0.000000e+00> : vector<1x8x128xf32>
    %31 = tpu.matmul %30, %19, %cst_19 {dimension_numbers = #tpu.dot_dimension_numbers<[2], [1], [1], [2], [0, 0, 0, 1, 1, 2], [0], [0]>} : vector<1x8x8xf32>, vector<1x8x128xf32>, vector<1x8x128xf32> -> vector<1x8x128xf32>
    "tpu.trace_stop"() : () -> ()
    %32 = vector.shape_cast %31 : vector<1x8x128xf32> to vector<8x128xf32>
    %c0_20 = arith.constant 0 : index
    %c0_21 = arith.constant 0 : index
    %33 = vector.load %arg8[%c0_20, %c0_21] : memref<128x128xf32, #tpu.memory_space<vmem>>, vector<128x128xf32>
    %cst_22 = arith.constant dense<0.000000e+00> : vector<8x128xf32>
    %34 = tpu.matmul %32, %33, %cst_22 {dimension_numbers = #tpu.dot_dimension_numbers<[1], [0], [0], [1], [0, 0, 1, 1], [], []>} : vector<8x128xf32>, vector<128x128xf32>, vector<8x128xf32> -> vector<8x128xf32>
    %c0_23 = arith.constant 0 : index
    %c0_24 = arith.constant 0 : index
    %35 = vector.load %arg9[%c0_23, %c0_24] : memref<1x128xf32, #tpu.memory_space<vmem>>, vector<1x128xf32>
    %36 = vector.broadcast %35 : vector<1x128xf32> to vector<8x128xf32>
    %37 = arith.addf %34, %36 : vector<8x128xf32>
    %38 = vector.shape_cast %37 : vector<8x128xf32> to vector<1x8x128xf32>
    %c0_25 = arith.constant 0 : index
    %c0_26 = arith.constant 0 : index
    %c0_27 = arith.constant 0 : index
    %39 = vector.load %arg10[%c0_25, %c0_26, %c0_27] : memref<1x8x128xf32, #tpu.memory_space<vmem>>, vector<1x8x128xf32>
    tpu.vector_store %arg10[%c0_25, %c0_26, %c0_27], %38 {strides = array<i32>} : memref<1x8x128xf32, #tpu.memory_space<vmem>>, vector<1x8x128xf32>,
    return
  }
  func.func @transform_0(%arg0: i32) -> (i32, i32, i32) {
    %c0_i32 = arith.constant 0 : i32
    %c0_i32_0 = arith.constant 0 : i32
    %c0_i32_1 = arith.constant 0 : i32
    return %arg0, %c0_i32, %c0_i32_0 : i32, i32, i32
  }
  func.func @transform_1(%arg0: i32) -> (i32, i32) {
    %c0_i32 = arith.constant 0 : i32
    %c0_i32_0 = arith.constant 0 : i32
    %c0_i32_1 = arith.constant 0 : i32
    return %c0_i32, %c0_i32_0 : i32, i32
  }
  func.func @transform_2(%arg0: i32) -> (i32, i32) {
    %c0_i32 = arith.constant 0 : i32
    %c0_i32_0 = arith.constant 0 : i32
    %c0_i32_1 = arith.constant 0 : i32
    return %c0_i32, %c0_i32_0 : i32, i32
  }
  func.func @transform_3(%arg0: i32) -> (i32, i32) {
    %c0_i32 = arith.constant 0 : i32
    %c0_i32_0 = arith.constant 0 : i32
    %c0_i32_1 = arith.constant 0 : i32
    return %c0_i32, %c0_i32_0 : i32, i32
  }
  func.func @transform_4(%arg0: i32) -> (i32, i32) {
    %c0_i32 = arith.constant 0 : i32
    %c0_i32_0 = arith.constant 0 : i32
    %c0_i32_1 = arith.constant 0 : i32
    return %c0_i32, %c0_i32_0 : i32, i32
  }
  func.func @transform_5(%arg0: i32) -> (i32, i32) {
    %c0_i32 = arith.constant 0 : i32
    %c0_i32_0 = arith.constant 0 : i32
    %c0_i32_1 = arith.constant 0 : i32
    return %c0_i32, %c0_i32_0 : i32, i32
  }
  func.func @transform_6(%arg0: i32) -> (i32, i32) {
    %c0_i32 = arith.constant 0 : i32
    %c0_i32_0 = arith.constant 0 : i32
    %c0_i32_1 = arith.constant 0 : i32
    return %c0_i32, %c0_i32_0 : i32, i32
  }
  func.func @transform_7(%arg0: i32) -> (i32, i32) {
    %c0_i32 = arith.constant 0 : i32
    %c0_i32_0 = arith.constant 0 : i32
    %c0_i32_1 = arith.constant 0 : i32
    return %c0_i32, %c0_i32_0 : i32, i32
  }
  func.func @transform_8(%arg0: i32) -> (i32, i32) {
    %c0_i32 = arith.constant 0 : i32
    %c0_i32_0 = arith.constant 0 : i32
    %c0_i32_1 = arith.constant 0 : i32
    return %c0_i32, %c0_i32_0 : i32, i32
  }
  func.func @transform_9(%arg0: i32) -> (i32, i32, i32) {
    %c0_i32 = arith.constant 0 : i32
    %c0_i32_0 = arith.constant 0 : i32
    %c0_i32_1 = arith.constant 0 : i32
    return %arg0, %c0_i32, %c0_i32_0 : i32, i32, i32
  }
}

</mosaic_0001>

<bundles_post_ra>
// kernel: tpu_custom_call.1
= control target key start
LH: loop header
LB: loop body
LE: loop exit
PB: predicated region body
PF: predicated region fallthrough
CT: control target
= control target key end

     0   :  { %s2135_s0 = inlined_call_operand.hbm [shape: f32[2,8,128], index: 0, kind: input, shape index: {}]   ;;  %s2136_s1 = inlined_call_operand.hbm [shape: f32[128,128], index: 1, kind: input, shape index: {}]   ;;  %s2137_s2 = inlined_call_operand.hbm [shape: f32[128,128], index: 2, kind: input, shape index: {}]   ;;  %s2138_s3 = inlined_call_operand.hbm [shape: f32[128,128], index: 3, kind: input, shape index: {}]   ;;  %s2139_s4 = inlined_call_operand.vmem [shape: f32[1,128], index: 4, kind: input, shape index: {}]   ;;  %s2140_s5 = inlined_call_operand.vmem [shape: f32[1,128], index: 5, kind: input, shape index: {}]   ;;  %s2141_s6 = inlined_call_operand.vmem [shape: f32[1,128], index: 6, kind: input, shape index: {}]   ;;  %s2142_s7 = inlined_call_operand.hbm [shape: f32[128,128], index: 7, kind: input, shape index: {}]   ;;  %s2143_s8 = inlined_call_operand.vmem [shape: f32[1,128], index: 8, kind: input, shape index: {}]   ;;  %s2144_s9 = inlined_call_operand.hbm [shape: f32[2,8,128], index: 9, kind: output, shape index: {}]  }
   0x1   :  { %2149 = sst [smem:[#allocation16_spill]] %s2136_s1 }
   0x2   :  { %2150 = sst [smem:[#allocation17_spill]] %s2144_s9 }
   0x3   :  { %14 = vsyncpa [#allocation3], 0 }
   0x4   :  { %16 = vsyncpa [#allocation3 + $0x1], 0 }
   0x5   :  { %17 = vsyncpa [#allocation6], 0 }
   0x6   :  { %18 = vsyncpa [#allocation9], 0 }
   0x7   :  { %19 = vsyncpa [#allocation4], 0 }
   0x8   :  { %21 = vsyncpa [#allocation4 + $0x1], 0  ;;  %s1775_s30 = smov 0   ;;  %s1777_s10 = smov 0  }
   0x9   :  { %s1779_s11 = smov 0   ;;  %s1781_s12 = smov 0  }
   0xa LB: > { %s1714_s13 = smov [#allocation5]   ;;  %s1796_s15 = sadd.s32 4294967295, %s1712_s12   ;;  %s1712_s12 = sphi %s1781_s12, %s2173_s12   ;;  %s1708_s11 = sphi %s1779_s11, %s2172_s11   ;;  %s1704_s10 = sphi %s1777_s10, %s2171_s10   ;;  %s1700_s30 = sphi %s1775_s30, %s2170_s30  }
   0xb   : > { %s264_s14 = sshll.u32 %s1714_s13, 4  ;;  %p1058_p0 = scmp.ge.s32.totalorder %s1712_s12, 1  ;;  %s1801_s14 = int_to_ptr.vmem [resolvable:$true] %s264_s14 }
   0xc   : > { %p2146_p1 = scmp.eq.s32.totalorder %s1796_s15, 0  ;;  %p252_p2 = scmp.lt.s32.totalorder %s1712_s12, 3 }
   0xd   : > { %s1715_s17 = smov [#allocation8]   ;;  %s1716_s20 = smov [#allocation7]  }
   0xe   : > { %p1803_p3 = pnand %p1058_p0, %p252_p2  ;;  %s290_s18 = sshll.u32 %s1715_s17, 4  ;;  %s1816_s18 = int_to_ptr.vmem [resolvable:$true] %s290_s18 }
   0xf   : > { %s277_s21 = sshll.u32 %s1716_s20, 4  ;;  %s2153_s1 = sld [smem:[#allocation16_spill]]  ;;  %s1818_s21 = int_to_ptr.vmem [resolvable:$true] %s277_s21 }
  0x10   : > { %s2151_s16 = scalar_select %p1803_p3, 1, 0 }
  0x11   : > { %p1420_p5 = pneg %p1803_p3 }
  0x13   : > { %p1812_p6 = pnand %p1420_p5, %p2146_p1 }
  0x15   : > { %s1496_s24 = scalar_lea.hbm %s2153_s1, 2048  ;;  %p1828_p8 = pneg %p1812_p6 }
  0x16   : > { %p1497_p7 = scmp.ne.s32.totalorder %s2153_s1, %s1496_s24  ;;  %p1503_p11 = scmp.lt.u32.totalorder %s1496_s24, %s2153_s1 }
  0x18   : > { %p1499_p9 = pnand %p1828_p8, %p1497_p7 }
  0x1a   : > { %p1500_p10 = pneg %p1499_p9 }
  0x1c   : > { %p1505_p12 = pnand %p1503_p11, %p1500_p10 }
  0x1e   : > { %1508 = shalt.err (!%p1505_p12)
}
  0x1f   : > { %s1509_s13 = scalar_lea.vmem %s1801_s14, 2048  ;;  %p1517_p5 = scmp.lt.s32.totalorder %s1801_s14, %s1801_s14 }
  0x20   : > { %p1510_p13 = scmp.ne.s32.totalorder %s1801_s14, %s1509_s13  ;;  %p1518_p4 = scmp.lt.s32.totalorder %s1509_s13, %s1509_s13 }
  0x22   : > { %p1512_p0 = pnand %p1510_p13, %p1828_p8  ;;  %p1519_p7 = por %p1518_p4, %p1517_p5 }
  0x24   : > { %p1513_p2 = pneg %p1512_p0 }
  0x26   : > { %p1520_p9 = pnand %p1519_p7, %p1513_p2 }
  0x28   : > { %1523 = shalt.err (!%p1520_p9)
}
  0x29   : > { %s1717_s17 = smov 128   ;;  %s1718_s20 = smov 8  }
  0x2a   : > { %1423 = dma.hbm_to_vmem [thread:$0]  (!%p1812_p6), %s2153_s1, 2048, %s1801_s14, [#allocation6], %s1717_s17, %s1717_s17, %s1718_s20  }
  0x2b   : > { %s1524_s26 = scalar_lea.hbm %s2138_s3, 2048 }
  0x2c   : > { %p1525_p4 = scmp.ne.s32.totalorder %s2138_s3, %s1524_s26  ;;  %p1531_p12 = scmp.lt.u32.totalorder %s1524_s26, %s2138_s3 }
  0x2e   : > { %p1527_p10 = pnand %p1525_p4, %p1828_p8 }
  0x30   : > { %p1528_p11 = pneg %p1527_p10 }
  0x32   : > { %p1533_p13 = pnand %p1531_p12, %p1528_p11 }
  0x34   : > { %1536 = shalt.err (!%p1533_p13)
}
  0x35   : > { %s1537_s14 = scalar_lea.vmem %s1816_s18, 2048  ;;  %p1545_p7 = scmp.lt.s32.totalorder %s1816_s18, %s1816_s18 }
  0x36   : > { %p1538_p0 = scmp.ne.s32.totalorder %s1816_s18, %s1537_s14  ;;  %p1546_p9 = scmp.lt.s32.totalorder %s1537_s14, %s1537_s14 }
  0x38   : > { %p1540_p2 = pnand %p1538_p0, %p1828_p8  ;;  %p1547_p4 = por %p1546_p9, %p1545_p7 }
  0x3a   : > { %p1541_p5 = pneg %p1540_p2 }
  0x3c   : > { %p1548_p10 = pnand %p1547_p4, %p1541_p5 }
  0x3e   : > { %1551 = shalt.err (!%p1548_p10)
}
  0x3f   : > { %1429 = dma.hbm_to_vmem [thread:$0]  (!%p1812_p6), %s2138_s3, 2048, %s1816_s18, [#allocation9], %s1717_s17, %s1717_s17, %s1718_s20  }
  0x40   : > { %s1552_s25 = scalar_lea.hbm %s2137_s2, 2048 }
  0x41   : > { %p1553_p11 = scmp.ne.s32.totalorder %s2137_s2, %s1552_s25  ;;  %p1559_p0 = scmp.lt.u32.totalorder %s1552_s25, %s2137_s2 }
  0x43   : > { %p1555_p12 = pnand %p1553_p11, %p1828_p8 }
  0x45   : > { %p1556_p13 = pneg %p1555_p12 }
  0x47   : > { %p1561_p2 = pnand %p1559_p0, %p1556_p13 }
  0x49   : > { %1564 = shalt.err (!%p1561_p2)
}
  0x4a   : > { %s1565_s18 = scalar_lea.vmem %s1818_s21, 2048  ;;  %p1573_p4 = scmp.lt.s32.totalorder %s1818_s21, %s1818_s21 }
  0x4b   : > { %p1566_p5 = scmp.ne.s32.totalorder %s1818_s21, %s1565_s18  ;;  %p1574_p10 = scmp.lt.s32.totalorder %s1565_s18, %s1565_s18 }
  0x4d   : > { %p1568_p7 = pnand %p1566_p5, %p1828_p8  ;;  %p1575_p11 = por %p1574_p10, %p1573_p4 }
  0x4f   : > { %p1569_p9 = pneg %p1568_p7 }
  0x51   : > { %p1576_p12 = pnand %p1575_p11, %p1569_p9 }
  0x53   : > { %1579 = shalt.err (!%p1576_p12)
}
  0x54   : > { %1426 = dma.hbm_to_vmem [thread:$0]  (!%p1812_p6), %s2137_s2, 2048, %s1818_s21, [#allocation6], %s1717_s17, %s1717_s17, %s1718_s20  }
  0x55   : > { %s1719_s22 = smov [#allocation10]   ;;  %s1580_s26 = scalar_lea.hbm %s2142_s7, 2048 }
  0x56   : > { %s312_s23 = sshll.u32 %s1719_s22, 4  ;;  %p1581_p13 = scmp.ne.s32.totalorder %s2142_s7, %s1580_s26  ;;  %s313_s23 = int_to_ptr.vmem [resolvable:$true] %s312_s23 }
  0x57   : > { %p1587_p5 = scmp.lt.u32.totalorder %s1580_s26, %s2142_s7 }
  0x58   : > { %p1583_p0 = pnand %p1581_p13, %p1828_p8 }
  0x5a   : > { %p1584_p2 = pneg %p1583_p0 }
  0x5c   : > { %p1589_p7 = pnand %p1587_p5, %p1584_p2 }
  0x5e   : > { %1592 = shalt.err (!%p1589_p7)
}
  0x5f   : > { %s1593_s21 = scalar_lea.vmem %s313_s23, 2048  ;;  %p1601_p11 = scmp.lt.s32.totalorder %s313_s23, %s313_s23 }
  0x60   : > { %p1594_p9 = scmp.ne.s32.totalorder %s313_s23, %s1593_s21  ;;  %p1602_p12 = scmp.lt.s32.totalorder %s1593_s21, %s1593_s21 }
  0x62   : > { %p1596_p4 = pnand %p1594_p9, %p1828_p8  ;;  %p1603_p1 = por %p1602_p12, %p1601_p11 }
  0x64   : > { %p1597_p10 = pneg %p1596_p4 }
  0x66   : > { %p1604_p3 = pnand %p1603_p1, %p1597_p10 }
  0x68   : > { %1607 = shalt.err (!%p1604_p3)
}
  0x69   : > { %1432 = dma.hbm_to_vmem [thread:$0]  (!%p1812_p6), %s2142_s7, 2048, %s313_s23, [#allocation9], %s1717_s17, %s1717_s17, %s1718_s20  }
  0x6a   : > { %s1057_s19 = sadd.s32 4294967294, %s1712_s12   ;;  %s1927_s27 = sadd.s32 1, %s1712_s12  }
  0x6b   : > { %s31_s22 = ssub.s32 %s1712_s12, %s1927_s27  ;;  %s34_s24 = sadd.s32 1, %s1708_s11 }
  0x6c   : > { %p32_p1 = scmp.eq.s32.totalorder %s31_s22, 0  ;;  %p41_p3 = scmp.ne.s32.totalorder %s1708_s11, %s1704_s10 }
  0x6d   : > { %p42_p8 = scmp.eq.s32.totalorder %s1712_s12, 0  ;;  %p47_p13 = scmp.ne.s32.totalorder %s1704_s10, %s1700_s30 }
  0x6e   : > { %s1938_s25 = scalar_select %p32_p1, %s1708_s11, %s34_s24  }
  0x6f   : > { %p1940_p0 = por %p42_p8, %p41_p3  ;;  %p2156_p2 = scmp.eq.s32.totalorder %s1796_s15, 0 }
  0x70   : > { %p239_p5 = scmp.eq.s32.totalorder %s1796_s15, 1  ;;  %p245_p7 = scmp.eq.s32.totalorder %s1057_s19, 1 }
  0x71   : > { %p1946_p6 = por %p2156_p2, %p47_p13  ;;  %p1445_p9 = scmp.lt.s32.totalorder %s1712_s12, 2 }
  0x72   : > { %s329_s20 = sand.u32 1, %s1708_s11   ;;  %p1953_p4 = por %p239_p5, %p41_p3 }
  0x73   : > { %p1957_p10 = por %p245_p7, %p47_p13  ;;  %s1064_s29 = sshll.u32 %s329_s20, 3 }
  0x74   : > { %s2158_s23 = scalar_select %p1953_p4, 1, 0 }
  0x75   : > { %s2159_s28 = scalar_select %p1957_p10, 1, 0 }
  0x76   : > { %s1065_s13 = sshll.u32 %s1712_s12, 7  ;;  %s333_s9 = scalar_lea.vmem [#allocation2], %s1064_s29 }
  0x77   : > { %s1965_s14 = scalar_lea.hbm %s2135_s0, %s1065_s13  ;;  %s340_s19 = sshll.u32 %s333_s9, 4  ;;  %s1967_s19 = int_to_ptr.vmem [resolvable:$true] %s340_s19 }
  0x78   : > { %p1971_p11 = pnand %p1445_p9, %p1940_p0  ;;  %s330_s24 = scalar_lea.sflag [#allocation3], %s329_s20 }
  0x79   : > { %s1608_s1 = scalar_lea.hbm %s1965_s14, 128  ;;  %s1613_s18 = scalar_lea.hbm %s2135_s0, 256 }
  0x7a   : > { %p1609_p12 = scmp.ne.s32.totalorder %s1965_s14, %s1608_s1  ;;  %p1610_p1 = pneg %p1971_p11 }
  0x7b   : > { %p1614_p13 = scmp.lt.u32.totalorder %s1965_s14, %s2135_s0  ;;  %p1615_p0 = scmp.lt.u32.totalorder %s1613_s18, %s1608_s1 }
  0x7c   : > { %p1611_p3 = pnand %p1610_p1, %p1609_p12  ;;  %p1617_p5 = scmp.lt.u32.totalorder %s1608_s1, %s1965_s14 }
  0x7d   : > { %p1616_p2 = por %p1615_p0, %p1614_p13 }
  0x7e   : > { %p1612_p8 = pneg %p1611_p3 }
  0x7f   : > { %p1618_p7 = por %p1617_p5, %p1616_p2 }
  0x81   : > { %p1619_p9 = pnand %p1618_p7, %p1612_p8 }
  0x83   : > { %1622 = shalt.err (!%p1619_p9)
}
  0x84   : > { %s1623_s20 = scalar_lea.vmem %s1967_s19, 128  ;;  %s1720_s9 = smov [#allocation2]  }
  0x85   : > { %p1624_p12 = scmp.ne.s32.totalorder %s1967_s19, %s1623_s20  ;;  %s1628_s29 = sshll.u32 %s1720_s9, 4  ;;  %s1629_s29 = int_to_ptr.vmem [resolvable:$false] %s1628_s29 }
  0x86   : > { %s1630_s13 = scalar_lea.vmem %s1629_s29, 256  ;;  %p1631_p4 = scmp.lt.s32.totalorder %s1967_s19, %s1629_s29 }
  0x87   : > { %p1626_p3 = pnand %p1624_p12, %p1610_p1  ;;  %p1632_p13 = scmp.lt.s32.totalorder %s1630_s13, %s1623_s20 }
  0x89   : > { %p1627_p10 = pneg %p1626_p3  ;;  %p1633_p0 = por %p1632_p13, %p1631_p4 }
  0x8b   : > { %p1634_p2 = pnand %p1633_p0, %p1627_p10 }
  0x8d   : > { %1637 = shalt.err (!%p1634_p2)
}
  0x8e   : > { %1436 = dma.hbm_to_vmem [thread:$0]  (!%p1971_p11), %s1965_s14, 128, %s1967_s19, %s330_s24  }
  0x8f   : > { %p2161_p8 = scmp.ne.s32.totalorder %s2151_s16, 0 }
  0x90   : > { %s2003_s1 = sand.u32 (!%p2161_p8), 1, %s1704_s10  }
  0x91   : > { %349 = sbr.rel (%p2161_p8) target bundleno = 1376 (0x560), region = 56  ;;  %s1067_s18 = sshll.u32 (!%p2161_p8), %s2003_s1, 3 }
  0x92   : > { %s352_s26 = scalar_lea.sflag (!%p2161_p8), [#allocation3], %s2003_s1  ;;  %s2009_s21 = scalar_lea.vmem (!%p2161_p8), [#allocation2], %s1067_s18 }
  0x98   : > { %1683 = dma.done.wait (%p1946_p6), %s352_s26, 128  }
  0x99   : > { %1685 = vsyncadd (%p1946_p6), %s352_s26, 4294967168  ;;  %p2162_p4 = scmp.eq.s32.totalorder %s1796_s15, 0 }
  0x9b   : > { %1687 = dma.done.wait (%p2162_p4), [#allocation6], 4096   ;;  %p2163_p10 = pmov %p2162_p4 }
  0x9c   : > { %p2164_p11 = pmov %p2162_p4 }
  0x9d   : > { %1689 = vsyncadd (%p2163_p10), [#allocation6], 4294963200 }
  0x9e   : > { %1691 = dma.done.wait (%p2164_p11), [#allocation9], 4096   ;;  %p2165_p1 = pmov %p2162_p4 }
  0x9f   : > { %v1721_v0 = vmov 0.0|0.0   ;;  %vm1722_vm0 = vmmov 0   ;;  %v1723_v1 = vmov 0.0   ;;  %v500_v2 = vld [vmem:[#allocation7] sm:$0xff]  ;;  %v501_v3 = vld [vmem:[#allocation7 + $0x8] sm:$0xff]  ;;  %v502_v7 = vld [vmem:[#allocation7 + $0x10] sm:$0xff] }
  0xa0   : > { %1693 = vsyncadd (%p2165_p1), [#allocation9], 4294963200  ;;  %1328 = vmatprep.subr.bf16.mxu1 %v1721_v0  ;;  %1304 = vmatprep.subr.bf16.mxu0 %v1721_v0  ;;  %v407_v4 = vld [vmem:[#allocation5] sm:$0xff]  ;;  %v1329_v5 = vpack.c.bf16 %v501_v3, %v500_v2  ;;  %v408_v6 = vld [vmem:[#allocation5 + $0x8] sm:$0xff]  ;;  %vm756_vm1 = vcmask 64512   ;;  %s1079_s29 = sshll.u32 %s1796_s15, 7 }
  0xa1   : > { %1221 = vmatprep.mubr.msk.f32.mxu1 %vm1722_vm0, %v1723_v1  ;;  %1186 = vmatprep.mubr.msk.f32.mxu0 %vm1722_vm0, %v1723_v1  ;;  %v503_v8 = vld [vmem:[#allocation7 + $0x18] sm:$0xff]  ;;  %v1305_v9 = vpack.c.bf16 %v408_v6, %v407_v4  ;;  %v409_v10 = vld [vmem:[#allocation5 + $0x10] sm:$0xff]  ;;  %v504_v14 = vld [vmem:[#allocation7 + $0x20] sm:$0xff]  ;;  %s405_s13 = scalar_lea.vmem [#allocation11], %s1067_s18  ;;  %s2166_s17 = sld [smem:[#allocation17_spill]] }
  0xa2   : > { %v410_v11 = vld [vmem:[#allocation5 + $0x18] sm:$0xff]  ;;  %1330 = vmatpush3.bf16.msra.mxu1 %v1329_v5  ;;  %v1332_v12 = vpack.c.bf16 %v503_v8, %v502_v7  ;;  %v505_v15 = vld [vmem:[#allocation7 + $0x28] sm:$0xff]  ;;  %v411_v16 = vld [vmem:[#allocation5 + $0x20] sm:$0xff]  ;;  %s949_s26 = sshll.u32 %s405_s13, 4  ;;  %s936_s19 = scalar_lea.sflag [#allocation4], %s2003_s1  ;;  %s2093_s26 = int_to_ptr.vmem [resolvable:$true] %s949_s26 }
  0xa3   : > { %1306 = vmatpush3.bf16.msra.mxu0 %v1305_v9  ;;  %1331 = vmatprep.subr.bf16.mxu1 %v1721_v0  ;;  %v1308_v13 = vpack.c.bf16 %v410_v11, %v409_v10  ;;  %v412_v17 = vld [vmem:[#allocation5 + $0x28] sm:$0xff]  ;;  %v1335_v18 = vpack.c.bf16 %v505_v15, %v504_v14  ;;  %v506_v20 = vld [vmem:[#allocation7 + $0x30] sm:$0xff]  ;;  %v507_v21 = vld [vmem:[#allocation7 + $0x38] sm:$0xff]  ;;  %s1638_s22 = scalar_lea.vmem %s2093_s26, 128  ;;  %p2167_p5 = scmp.ne.s32.totalorder %s2158_s23, 0 }
  0xa4   : > { %1307 = vmatprep.subr.bf16.mxu0 %v1721_v0  ;;  %v1311_v19 = vpack.c.bf16 %v412_v17, %v411_v16  ;;  %v413_v22 = vld [vmem:[#allocation5 + $0x30] sm:$0xff]  ;;  %v414_v23 = vld [vmem:[#allocation5 + $0x38] sm:$0xff]  ;;  %v1338_v24 = vpack.c.bf16 %v507_v21, %v506_v20  ;;  %v508_v26 = vld [vmem:[#allocation7 + $0x40] sm:$0xff]  ;;  %p1639_p6 = scmp.ne.s32.totalorder %s2093_s26, %s1638_s22  ;;  %s1724_s15 = smov [#allocation11]  }
  0xa5   : > { %v1314_v25 = vpack.c.bf16 %v414_v23, %v413_v22  ;;  %v509_v27 = vld [vmem:[#allocation7 + $0x48] sm:$0xff]  ;;  %v415_v28 = vld [vmem:[#allocation5 + $0x40] sm:$0xff]  ;;  %v510_v32 = vld [vmem:[#allocation7 + $0x50] sm:$0xff]  ;;  %s1642_s18 = sshll.u32 %s1724_s15, 4  ;;  %s1643_s18 = int_to_ptr.vmem [resolvable:$false] %s1642_s18 }
  0xa6   : > { %1333 = vmatpush3.bf16.msra.mxu1 %v1332_v12  ;;  %v416_v29 = vld [vmem:[#allocation5 + $0x48] sm:$0xff]  ;;  %v1341_v30 = vpack.c.bf16 %v509_v27, %v508_v26  ;;  %v511_v33 = vld [vmem:[#allocation7 + $0x58] sm:$0xff]  ;;  %v417_v34 = vld [vmem:[#allocation5 + $0x50] sm:$0xff]  ;;  %p1640_p7 = pnand %p1639_p6, %p2167_p5  ;;  %s1644_s24 = scalar_lea.vmem %s1643_s18, 256 }
  0xa7   : > { %1309 = vmatpush3.bf16.msra.mxu0 %v1308_v13  ;;  %1334 = vmatprep.subr.bf16.mxu1 %v1721_v0  ;;  %v1317_v31 = vpack.c.bf16 %v416_v29, %v415_v28  ;;  %v418_v35 = vld [vmem:[#allocation5 + $0x58] sm:$0xff]  ;;  %v1344_v36 = vpack.c.bf16 %v511_v33, %v510_v32  ;;  %v512_v38 = vld [vmem:[#allocation7 + $0x60] sm:$0xff]  ;;  %v513_v39 = vld [vmem:[#allocation7 + $0x68] sm:$0xff]  ;;  %s2091_s14 = scalar_lea.hbm %s2166_s17, %s1079_s29  ;;  %p1645_p12 = scmp.lt.s32.totalorder %s2093_s26, %s1643_s18 }
  0xa8   : > { %1310 = vmatprep.subr.bf16.mxu0 %v1721_v0  ;;  %v1320_v37 = vpack.c.bf16 %v418_v35, %v417_v34  ;;  %v419_v40 = vld [vmem:[#allocation5 + $0x60] sm:$0xff]  ;;  %v420_v41 = vld [vmem:[#allocation5 + $0x68] sm:$0xff]  ;;  %v1347_v42 = vpack.c.bf16 %v513_v39, %v512_v38  ;;  %v514_v44 = vld [vmem:[#allocation7 + $0x70] sm:$0xff]  ;;  %p1641_p9 = pneg %p1640_p7  ;;  %p1646_p3 = scmp.lt.s32.totalorder %s1644_s24, %s1638_s22 }
  0xa9   : > { %v1323_v43 = vpack.c.bf16 %v420_v41, %v419_v40  ;;  %v515_v45 = vld [vmem:[#allocation7 + $0x78] sm:$0xff]  ;;  %v421_v46 = vld [vmem:[#allocation5 + $0x70] sm:$0xff]  ;;  %v593_v50 = vld [vmem:[#allocation8] sm:$0xff] }
  0xaa   : > { %1336 = vmatpush3.bf16.msra.mxu1 %v1335_v18  ;;  %v422_v47 = vld [vmem:[#allocation5 + $0x78] sm:$0xff]  ;;  %v1350_v48 = vpack.c.bf16 %v515_v45, %v514_v44  ;;  %v594_v51 = vld [vmem:[#allocation8 + $0x8] sm:$0xff]  ;;  %v595_v54 = vld [vmem:[#allocation8 + $0x10] sm:$0xff]  ;;  %p1647_p13 = por %p1646_p3, %p1645_p12 }
  0xab   : > { %1312 = vmatpush3.bf16.msra.mxu0 %v1311_v19  ;;  %1337 = vmatprep.subr.bf16.mxu1 %v1721_v0  ;;  %v1326_v49 = vpack.c.bf16 %v422_v47, %v421_v46  ;;  %v406_v52 = vld [vmem:[%s2009_s21] sm:$0xff]  ;;  %v1353_v53 = vpack.c.bf16 %v594_v51, %v593_v50  ;;  %v597_v57 = vld [vmem:[#allocation8 + $0x20] sm:$0xff]  ;;  %v598_v58 = vld [vmem:[#allocation8 + $0x28] sm:$0xff] }
  0xac   : > { %1313 = vmatprep.subr.bf16.mxu0 %v1721_v0  ;;  %v596_v55 = vld [vmem:[#allocation8 + $0x18] sm:$0xff]  ;;  %v1359_v59 = vpack.c.bf16 %v598_v58, %v597_v57  ;;  %v599_v60 = vld [vmem:[#allocation8 + $0x30] sm:$0xff]  ;;  %v601_v63 = vld [vmem:[#allocation8 + $0x40] sm:$0xff]  ;;  %p1648_p0 = pnand %p1647_p13, %p1641_p9 }
  0xad   : > { %v1356_v56 = vpack.c.bf16 %v596_v55, %v595_v54  ;;  %v600_v61 = vld [vmem:[#allocation8 + $0x38] sm:$0xff]  ;;  %v602_v2 = vld [vmem:[#allocation8 + $0x48] sm:$0xff]  ;;  %v603_v4 = vld [vmem:[#allocation8 + $0x50] sm:$0xff] }
  0xae   : > { %1339 = vmatpush3.bf16.msra.mxu1 %v1338_v24  ;;  %v1362_v62 = vpack.c.bf16 %v600_v61, %v599_v60  ;;  %v1365_v3 = vpack.c.bf16 %v602_v2, %v601_v63  ;;  %v604_v5 = vld [vmem:[#allocation8 + $0x58] sm:$0xff]  ;;  %v605_v7 = vld [vmem:[#allocation8 + $0x60] sm:$0xff]  ;;  %v606_v8 = vld [vmem:[#allocation8 + $0x68] sm:$0xff] }
  0xaf   : > { %1315 = vmatpush3.bf16.msra.mxu0 %v1314_v25  ;;  %1340 = vmatprep.subr.bf16.mxu1 %v1721_v0  ;;  %v1368_v6 = vpack.c.bf16 %v604_v5, %v603_v4  ;;  %v1371_v9 = vpack.c.bf16 %v606_v8, %v605_v7  ;;  %v607_v10 = vld [vmem:[#allocation8 + $0x70] sm:$0xff]  ;;  %v608_v11 = vld [vmem:[#allocation8 + $0x78] sm:$0xff]  ;;  %v841_v34 = vld [vmem:[#allocation10] sm:$0xff] }
  0xb0   : > { %1316 = vmatprep.subr.bf16.mxu0 %v1721_v0  ;;  %v1374_v12 = vpack.c.bf16 %v608_v11, %v607_v10  ;;  %v1074_v13 = vld [vmem:[%s2140_s5] ss:$0 sm:$0xff]  ;;  %v842_v35 = vld [vmem:[#allocation10 + $0x8] sm:$0xff]  ;;  %v844_v40 = vld [vmem:[#allocation10 + $0x18] sm:$0xff] }
  0xb1   : > { %v1073_v14 = vld [vmem:[%s2139_s4] ss:$0 sm:$0xff]  ;;  %v848_v46 = vld [vmem:[#allocation10 + $0x38] sm:$0xff]  ;;  %v854_v54 = vld [vmem:[#allocation10 + $0x68] sm:$0xff] }
  0xb2   : > { %1342 = vmatpush3.bf16.msra.mxu1 %v1341_v30  ;;  %v1075_v21 = vld [vmem:[%s2141_s6] ss:$0 sm:$0xff]  ;;  %v852_v51 = vld [vmem:[#allocation10 + $0x58] sm:$0xff] }
  0xb3   : > { %1318 = vmatpush3.bf16.msra.mxu0 %v1317_v31  ;;  %1343 = vmatprep.subr.bf16.mxu1 %v1721_v0  ;;  %v843_v39 = vld [vmem:[#allocation10 + $0x10] sm:$0xff]  ;;  %v856_v57 = vld [vmem:[#allocation10 + $0x78] sm:$0xff] }
  0xb4   : > { %1319 = vmatprep.subr.bf16.mxu0 %v1721_v0  ;;  %v1380_v41 = vpack.c.bf16 %v844_v40, %v843_v39  ;;  %v847_v45 = vld [vmem:[#allocation10 + $0x30] sm:$0xff] }
  0xb5   : > { %v1386_v47 = vpack.c.bf16 %v848_v46, %v847_v45  ;;  %v1077_v61 = vld [vmem:[%s2143_s8] ss:$0 sm:$0xff] }
  0xb6   : > { %1345 = vmatpush3.bf16.msra.mxu1 %v1344_v36 }
  0xb7   : > { %1321 = vmatpush3.bf16.msra.mxu0 %v1320_v37  ;;  %1346 = vmatprep.subr.bf16.mxu1 %v1721_v0  ;;  %v1377_v37 = vpack.c.bf16 %v842_v35, %v841_v34 }
  0xb8   : > { %1322 = vmatprep.subr.bf16.mxu0 %v1721_v0 }
  0xba   : > { %1348 = vmatpush3.bf16.msra.mxu1 %v1347_v42  ;;  %v845_v42 = vld [vmem:[#allocation10 + $0x20] sm:$0xff] }
  0xbb   : > { %1324 = vmatpush3.bf16.msra.mxu0 %v1323_v43  ;;  %1349 = vmatprep.subr.bf16.mxu1 %v1721_v0  ;;  %v846_v43 = vld [vmem:[#allocation10 + $0x28] sm:$0xff] }
  0xbc   : > { %1325 = vmatprep.subr.bf16.mxu0 %v1721_v0  ;;  %v1383_v44 = vpack.c.bf16 %v846_v43, %v845_v42 }
  0xbe   : > { %1351 = vmatpush3.bf16.msra.mxu1 %v1350_v48  ;;  %v849_v48 = vld [vmem:[#allocation10 + $0x40] sm:$0xff] }
  0xbf   : > { %1327 = vmatpush3.bf16.msra.mxu0 %v1326_v49  ;;  %1264 = vmatprep.subr.mxu1 %v1723_v1  ;;  %v850_v49 = vld [vmem:[#allocation10 + $0x48] sm:$0xff] }
  0xc0   : > { %1352 = vmatprep.subr.bf16.mxu0 %v1721_v0  ;;  %v1389_v50 = vpack.c.bf16 %v850_v49, %v849_v48 }
  0xc1   : > { %1222 = vmatmul.mubr.f32.vlgmr.msra.gmra.mrb[0].mxu1 %v406_v52 }
  0xc2   : > { %1187 = vmatmul.mubr.f32.vlgmr.msra.gmra.mrb[0].mxu0 %v406_v52  ;;  %1266 = vmatprep.mubr.msk.f32.mxu1 %vm1722_vm0, %v1723_v1 }
  0xc3   : > { %1354 = vmatpush3.bf16.msra.mxu0 %v1353_v53  ;;  %1256 = vmatprep.mubr.msk.f32.mxu0 %vm1722_vm0, %v1723_v1  ;;  %v853_v53 = vld [vmem:[#allocation10 + $0x60] sm:$0xff] }
  0xc4   : > { %1355 = vmatprep.subr.bf16.mxu0 %v1721_v0  ;;  %v1395_v55 = vpack.c.bf16 %v854_v54, %v853_v53 }
  0xc7   : > { %1357 = vmatpush3.bf16.msra.mxu0 %v1356_v56  ;;  %v855_v56 = vld [vmem:[#allocation10 + $0x70] sm:$0xff] }
  0xc8   : > { %1358 = vmatprep.subr.bf16.mxu0 %v1721_v0  ;;  %v1398_v58 = vpack.c.bf16 %v856_v57, %v855_v56 }
  0xcb   : > { %1360 = vmatpush3.bf16.msra.mxu0 %v1359_v59 }
  0xcc   : > { %1361 = vmatprep.subr.bf16.mxu0 %v1721_v0 }
  0xcf   : > { %1363 = vmatpush3.bf16.msra.mxu0 %v1362_v62 }
  0xd0   : > { %1364 = vmatprep.subr.bf16.mxu0 %v1721_v0 }
  0xd3   : > { %1366 = vmatpush3.bf16.msra.mxu0 %v1365_v3 }
  0xd4   : > { %1367 = vmatprep.subr.bf16.mxu0 %v1721_v0 }
  0xd7   : > { %1369 = vmatpush3.bf16.msra.mxu0 %v1368_v6 }
  0xd8   : > { %1370 = vmatprep.subr.bf16.mxu0 %v1721_v0 }
  0xdb   : > { %1372 = vmatpush3.bf16.msra.mxu0 %v1371_v9 }
  0xdc   : > { %1373 = vmatprep.subr.bf16.mxu0 %v1721_v0 }
  0xdf   : > { %1375 = vmatpush3.bf16.msra.mxu0 %v1374_v12 }
  0xe0   : > { %1259 = vmatprep.subr.mxu0 %v1723_v1 }
  0xe2   : > { %1257 = vmatmul.mubr.f32.vlgmr.msra.gmra.mrb[2].mxu0 %v406_v52 }
  0xe3   : > { %1261 = vmatprep.mubr.msk.f32.mxu0 %vm1722_vm0, %v1723_v1 }
 0x194   : > { %v589_v15 = vpop.f32.mrb[0].mxu1 }
 0x195   : > { %v590_v16 = vadd.f32 %v1074_v13, %v589_v15  ;;  %v1223_v17 = vpop.f32.mrb[1].mxu1  ;;  %v496_v18 = vpop.f32.mrb[0].mxu0 }
 0x196   : > { %v497_v19 = vadd.f32 %v1073_v14, %v496_v18  ;;  %v1188_v20 = vpop.f32.mrb[1].mxu0 }
 0x197   : > { %1260 = vmatpush3.xpose.msra.mxu0 %v590_v16 }
 0x19a   : > { %1262 = vmatmul.mubr.f32.vlgmr.msra.gmra.mrb[4].mxu0 %v497_v19 }
 0x1b5   : > { %v682_v22 = vpop.f32.mrb[2].mxu0 }
 0x1b6   : > { %v683_v23 = vadd.f32 %v1075_v21, %v682_v22  ;;  %v1258_v24 = vpop.f32.mrb[3].mxu0 }
 0x1b8   : > { %1265 = vmatpush3.msra.mxu1 %v683_v23 }
 0x1b9   : > { %1376 = vmatprep.subr.bf16.mxu1 %v1721_v0 }
 0x26d   : > { %v752_v25 = vpop.f32.mrb[4].mxu0 }
 0x26e   : > { %v1263_v26 = vpop.f32.mrb[5].mxu0  ;;  %v757_v27 = vsel %vm756_vm1, %v752_v25, -inf }
 0x26f   : > { %758 = vmax.xlane.f32.xlu0 %v757_v27 }
 0x2fc   : > { %v759_v28 = vpop.xlane.xlu0 %758 }
 0x2fd   : > { %v760_v29 = vsub.f32 %v752_v25, %v759_v28 }
 0x2ff   : > { %v761_v30 = vmul.f32 1.442695, %v760_v29 }
 0x301   : > { %1492 = vpow2.f32 %v761_v30 }
 0x30b   : > { %v1493_v31 = vpop.eup %1492 }
 0x30c   : > { %v763_v32 = vsel %vm756_vm1, %v1493_v31, 0.0 }
 0x30d   : > { %764 = vadd.xlane.f32.xlu0 %v763_v32 }
 0x39a   : > { %v765_v33 = vpop.xlane.xlu0 %764 }
 0x39b   : > { %1494 = vrcp.f32 %v765_v33 }
 0x3a5   : > { %v1495_v36 = vpop.eup %1494 }
 0x3a6   : > { %v767_v38 = vmul.f32 %v1495_v36, %v1493_v31 }
 0x3a8   : > { %1267 = vmatmul.mubr.msk.f32.vlgmr.msra.gmra.mrb[2].mxu1 %vm756_vm1, %v767_v38 }
 0x3a9   : > { %1378 = vmatpush3.bf16.msra.mxu1 %v1377_v37  ;;  %1301 = vmatprep.mubr.msk.f32.mxu1 %vm1722_vm0, %v1723_v1  ;;  %v851_v1 = vld [vmem:[#allocation10 + $0x50] sm:$0xff] }
 0x3aa   : > { %1379 = vmatprep.subr.bf16.mxu1 %v1721_v0  ;;  %v1392_v52 = vpack.c.bf16 %v852_v51, %v851_v1 }
 0x3ad   : > { %1381 = vmatpush3.bf16.msra.mxu1 %v1380_v41 }
 0x3ae   : > { %1382 = vmatprep.subr.bf16.mxu1 %v1721_v0 }
 0x3b1   : > { %1384 = vmatpush3.bf16.msra.mxu1 %v1383_v44 }
 0x3b2   : > { %1385 = vmatprep.subr.bf16.mxu1 %v1721_v0 }
 0x3b5   : > { %1387 = vmatpush3.bf16.msra.mxu1 %v1386_v47 }
 0x3b6   : > { %1388 = vmatprep.subr.bf16.mxu1 %v1721_v0 }
 0x3b9   : > { %1390 = vmatpush3.bf16.msra.mxu1 %v1389_v50 }
 0x3ba   : > { %1391 = vmatprep.subr.bf16.mxu1 %v1721_v0 }
 0x3bd   : > { %1393 = vmatpush3.bf16.msra.mxu1 %v1392_v52 }
 0x3be   : > { %1394 = vmatprep.subr.bf16.mxu1 %v1721_v0 }
 0x3c1   : > { %1396 = vmatpush3.bf16.msra.mxu1 %v1395_v55 }
 0x3c2   : > { %1397 = vmatprep.subr.bf16.mxu1 %v1721_v0 }
 0x3c5   : > { %1399 = vmatpush3.bf16.msra.mxu1 %v1398_v58 }
 0x47b   : > { %v837_v59 = vpop.f32.mrb[2].mxu1 }
 0x47c   : > { %v1268_v60 = vpop.f32.mrb[3].mxu1  ;;  %1302 = vmatmul.mubr.f32.vlgmr.msra.gmra.mrb[4].mxu1 %v837_v59 }
 0x54f   : > { %v930_v62 = vpop.f32.mrb[4].mxu1 }
 0x550   : > { %v931_v63 = vadd.f32 %v1077_v61, %v930_v62  ;;  %v1303_v2 = vpop.f32.mrb[5].mxu1 }
 0x552   : > { %934 = vst [vmem:[%s405_s13] sm:$0xff] %v931_v63 }
 0x553   : > { %1651 = shalt.err (!%p1648_p0)
}
 0x554   : > { %s1652_s1 = scalar_lea.hbm %s2091_s14, 128  ;;  %s1656_s29 = scalar_lea.hbm %s2166_s17, 256 }
 0x555   : > { %p1653_p2 = scmp.ne.s32.totalorder %s2091_s14, %s1652_s1  ;;  %p1657_p10 = scmp.lt.u32.totalorder %s2091_s14, %s2166_s17 }
 0x556   : > { %p1658_p11 = scmp.lt.u32.totalorder %s1656_s29, %s1652_s1  ;;  %p1660_p6 = scmp.lt.u32.totalorder %s1652_s1, %s2091_s14 }
 0x557   : > { %p1654_p8 = pnand %p1653_p2, %p2167_p5 }
 0x558   : > { %p1659_p1 = por %p1658_p11, %p1657_p10 }
 0x559   : > { %p1655_p4 = pneg %p1654_p8 }
 0x55a   : > { %p1661_p7 = por %p1660_p6, %p1659_p1 }
 0x55c   : > { %p1662_p9 = pnand %p1661_p7, %p1655_p4 }
 0x55e   : > { %1665 = shalt.err (!%p1662_p9)
}
 0x55f   : > { %1418 = dma.vmem_to_hbm [thread:$0]  (%p2167_p5), %s2093_s26, 128, %s2091_s14, %s936_s19  }
 0x560 PF: > { %s961_s16 = sand.u32 1, %s1700_s30   ;;  %p2168_p12 = scmp.ne.s32.totalorder %s2159_s28, 0 }
 0x561   : > { %p2169_p3 = scmp.ge.s32.totalorder %s1712_s12, 2  ;;  %s962_s22 = scalar_lea.sflag [#allocation4], %s961_s16 }
 0x563   : > { %p1438_p13 = pnand %p2169_p3, %p2168_p12 }
 0x565   : > { %1695 = dma.done.wait (!%p1438_p13), %s962_s22, 128  }
 0x566   : > { %1697 = vsyncadd (!%p1438_p13), %s962_s22, 4294967168  ;;  %p24_p0 = scmp.ge.s32.totalorder %s1927_s27, 4   ;;  %s2170_s30 = smov %s1704_s10 }
 0x567   : > { %s2171_s10 = smov %s1708_s11  ;;  %s2172_s11 = smov %s1938_s25 }
 0x568   : > { %s2173_s12 = smov %s1927_s27  ;;  %26 = sbr.rel (!%p24_p0) target bundleno = 10 (0xa), region = 117 }
 0x56f   :  { %967 = vsyncpa [#allocation3], 1 }
 0x570   :  { %969 = vsyncpa [#allocation3 + $0x1], 1 }
 0x571   :  { %970 = vsyncpa [#allocation6], 1 }
 0x572   :  { %971 = vsyncpa [#allocation9], 1 }
 0x573   :  { %972 = vsyncpa [#allocation4], 1 }
 0x574   :  { %974 = vsyncpa [#allocation4 + $0x1], 1 }

</bundles_post_ra>
